<compile_context>
chip_gen: v6e
topology: v6e:2x2x1
jax: 0.10.0
libtpu: 0.0.40
codegen_flags: <defaults>
</compile_context>

<pallas_src>
import functools

import jax
import jax.numpy as jnp
from jax.experimental import pallas as pl
from jax.experimental.pallas import tpu as pltpu

SUBLANE = 8


def _round_up(x, m):
    return ((x + m - 1) // m) * m


def policy_kernel(x_ref, w1_ref, b1_ref, w2_ref, b2_ref, w3_ref, b3_ref,
                  mean_ref):
    x = x_ref[...]

    # Layer 1: Linear + ReLU
    h1 = jnp.dot(x, w1_ref[...], preferred_element_type=jnp.float32) + b1_ref[...]
    h1 = jnp.maximum(h1, 0.0)

    # Layer 2: Linear + ReLU
    h2 = jnp.dot(h1, w2_ref[...], preferred_element_type=jnp.float32) + b2_ref[...]
    h2 = jnp.maximum(h2, 0.0)

    # Mean head: Linear + sigmoid (exp lands on the EUP slot)
    logits = jnp.dot(h2, w3_ref[...], preferred_element_type=jnp.float32) + b3_ref[...]
    mean_ref[...] = jax.nn.sigmoid(logits)


@functools.partial(jax.jit, static_argnames=("tb_max",))
def policy_net_forward(state, params, *, tb_max=4096):
    """state: (B, state_dim) f32.  Returns (mean (B, action_dim), std (action_dim,))."""
    w1, b1, w2, b2, w3, b3, log_std = params
    B, state_dim = state.shape
    hidden = w1.shape[1]
    action_dim = w3.shape[1]

    # ---- batch tiling --------------------------------------------------------
    # Tile rows in multiples of 8 sublanes.  Cap the tile at ceil(B/2) so that
    # for any non-tiny batch the grid has >= 2 steps and the "parallel" axis can
    # use both v7x TensorCores.  tb_max=4096 keeps the working set ~7 MiB.
    tb = min(tb_max, _round_up(max(1, (B + 1) // 2), SUBLANE))
    Bp = _round_up(B, tb)
    if Bp != B:
        state = jnp.zeros((Bp, state_dim), state.dtype).at[:B].set(state)
    grid = (Bp // tb,)

    # Weights/biases: constant block index -> fetched once, stay VMEM-resident.
    resident = lambda shape: pl.BlockSpec(shape, lambda i: (0, 0))

    flops = 2 * Bp * (state_dim * hidden + hidden * hidden + hidden * action_dim)
    bytes_accessed = 4 * (
        Bp * state_dim + Bp * action_dim
        + state_dim * hidden + hidden * hidden + hidden * action_dim
        + 2 * hidden + action_dim
    )

    mean_full = pl.pallas_call(
        policy_kernel,
        out_shape=jax.ShapeDtypeStruct((Bp, action_dim), jnp.float32),
        grid=grid,
        in_specs=[
            pl.BlockSpec((tb, state_dim), lambda i: (i, 0)),   # streamed per tile
            resident((state_dim, hidden)), resident((1, hidden)),
            resident((hidden, hidden)),    resident((1, hidden)),
            resident((hidden, action_dim)), resident((1, action_dim)),
        ],
        out_specs=pl.BlockSpec((tb, action_dim), lambda i: (i, 0)),
        compiler_params=pltpu.CompilerParams(
            dimension_semantics=("parallel",),
        ),
        cost_estimate=pl.CostEstimate(
            flops=flops,
            bytes_accessed=bytes_accessed,
            transcendentals=Bp * action_dim,
        ),
    )(state, w1, b1, w2, b2, w3, b3)

    mean = mean_full if Bp == B else mean_full[:B]
    std = jnp.exp(log_std)  # (action_dim,) — batch-independent, stays in the wrapper
    return mean, std


def init_params(key, state_dim, action_dim, hidden=64):
    """Deterministic synthetic parameters (uniform +/- 1/sqrt(fan_in), torch-style)."""
    ks = jax.random.split(key, 6)

    def lin(kw, kb, fan_in, fan_out):
        bound = 1.0 / jnp.sqrt(fan_in)
        w = jax.random.uniform(kw, (fan_in, fan_out), jnp.float32, -bound, bound)
        b = jax.random.uniform(kb, (1, fan_out), jnp.float32, -bound, bound)
        return w, b

    w1, b1 = lin(ks[0], ks[1], state_dim, hidden)
    w2, b2 = lin(ks[2], ks[3], hidden, hidden)
    w3, b3 = lin(ks[4], ks[5], hidden, action_dim)
    log_std = jnp.full((action_dim,), -0.5, dtype=jnp.float32)
    return (w1, b1, w2, b2, w3, b3, log_std)


if __name__ == "__main__":
    B, STATE_DIM, ACTION_DIM, HIDDEN = 8, 16, 4, 64

    key = jax.random.PRNGKey(0)
    k_state, k_params = jax.random.split(key)
    state = jax.random.normal(k_state, (B, STATE_DIM), dtype=jnp.float32)
    params = init_params(k_params, STATE_DIM, ACTION_DIM, HIDDEN)

    mean, std = policy_net_forward(state, params)
    jax.block_until_ready((mean, std))

    # Reference check in plain JAX
    w1, b1, w2, b2, w3, b3, log_std = params
    h1 = jnp.maximum(state @ w1 + b1, 0.0)
    h2 = jnp.maximum(h1 @ w2 + b2, 0.0)
    mean_ref = jax.nn.sigmoid(h2 @ w3 + b3)
    std_ref = jnp.exp(log_std)
    assert mean.shape == (B, ACTION_DIM) and std.shape == (ACTION_DIM,)
    assert jnp.allclose(mean, mean_ref, atol=1e-5), "mean mismatch"
    assert jnp.allclose(std, std_ref, atol=1e-6), "std mismatch"

    print("KERNEL_OK")
</pallas_src>

<mosaic_0001>
module attributes {stable_mosaic.version = 11 : i64} {
  func.func @policy_kernel(%arg0: i32, %arg1: memref<8x16xf32, #tpu.memory_space<vmem>>, %arg2: memref<16x64xf32, #tpu.memory_space<vmem>>, %arg3: memref<1x64xf32, #tpu.memory_space<vmem>>, %arg4: memref<64x64xf32, #tpu.memory_space<vmem>>, %arg5: memref<1x64xf32, #tpu.memory_space<vmem>>, %arg6: memref<64x4xf32, #tpu.memory_space<vmem>>, %arg7: memref<1x4xf32, #tpu.memory_space<vmem>>, %arg8: memref<8x4xf32, #tpu.memory_space<vmem>>) attributes {dimension_semantics = [#tpu.dimension_semantics<parallel>], iteration_bounds = array<i64: 1>, scalar_prefetch = 0 : i64, scratch_operands = 0 : i64, tpu.core_type = #tpu.core_type<tc>, window_params = [{transform_indices = @transform_0, window_bounds = array<i64: 8, 16>}, {pipeline_mode = #tpu.pipeline_mode<synchronous>, transform_indices = @transform_1, window_bounds = array<i64: 16, 64>}, {pipeline_mode = #tpu.pipeline_mode<synchronous>, transform_indices = @transform_2, window_bounds = array<i64: 1, 64>}, {pipeline_mode = #tpu.pipeline_mode<synchronous>, transform_indices = @transform_3, window_bounds = array<i64: 64, 64>}, {pipeline_mode = #tpu.pipeline_mode<synchronous>, transform_indices = @transform_4, window_bounds = array<i64: 1, 64>}, {pipeline_mode = #tpu.pipeline_mode<synchronous>, transform_indices = @transform_5, window_bounds = array<i64: 64, 4>}, {pipeline_mode = #tpu.pipeline_mode<synchronous>, transform_indices = @transform_6, window_bounds = array<i64: 1, 4>}, {transform_indices = @transform_7, window_bounds = array<i64: 8, 4>}]} {
    %c0 = arith.constant 0 : index
    %c0_0 = arith.constant 0 : index
    %0 = vector.load %arg1[%c0, %c0_0] : memref<8x16xf32, #tpu.memory_space<vmem>>, vector<8x16xf32>
    %c0_1 = arith.constant 0 : index
    %c0_2 = arith.constant 0 : index
    %1 = vector.load %arg2[%c0_1, %c0_2] : memref<16x64xf32, #tpu.memory_space<vmem>>, vector<16x64xf32>
    %cst = arith.constant dense<0.000000e+00> : vector<8x64xf32>
    %2 = tpu.matmul %0, %1, %cst {dimension_numbers = #tpu.dot_dimension_numbers<[1], [0], [0], [1], [0, 0, 1, 1], [], []>} : vector<8x16xf32>, vector<16x64xf32>, vector<8x64xf32> -> vector<8x64xf32>
    %c0_3 = arith.constant 0 : index
    %c0_4 = arith.constant 0 : index
    %3 = vector.load %arg3[%c0_3, %c0_4] : memref<1x64xf32, #tpu.memory_space<vmem>>, vector<1x64xf32>
    %4 = vector.broadcast %3 : vector<1x64xf32> to vector<8x64xf32>
    %5 = arith.addf %2, %4 : vector<8x64xf32>
    %cst_5 = arith.constant 0.000000e+00 : f32
    %6 = vector.broadcast %cst_5 : f32 to vector<8x64xf32>
    %7 = arith.maximumf %5, %6 : vector<8x64xf32>
    %c0_6 = arith.constant 0 : index
    %c0_7 = arith.constant 0 : index
    %8 = vector.load %arg4[%c0_6, %c0_7] : memref<64x64xf32, #tpu.memory_space<vmem>>, vector<64x64xf32>
    %cst_8 = arith.constant dense<0.000000e+00> : vector<8x64xf32>
    %9 = tpu.matmul %7, %8, %cst_8 {dimension_numbers = #tpu.dot_dimension_numbers<[1], [0], [0], [1], [0, 0, 1, 1], [], []>} : vector<8x64xf32>, vector<64x64xf32>, vector<8x64xf32> -> vector<8x64xf32>
    %c0_9 = arith.constant 0 : index
    %c0_10 = arith.constant 0 : index
    %10 = vector.load %arg5[%c0_9, %c0_10] : memref<1x64xf32, #tpu.memory_space<vmem>>, vector<1x64xf32>
    %11 = vector.broadcast %10 : vector<1x64xf32> to vector<8x64xf32>
    %12 = arith.addf %9, %11 : vector<8x64xf32>
    %cst_11 = arith.constant 0.000000e+00 : f32
    %13 = vector.broadcast %cst_11 : f32 to vector<8x64xf32>
    %14 = arith.maximumf %12, %13 : vector<8x64xf32>
    %c0_12 = arith.constant 0 : index
    %c0_13 = arith.constant 0 : index
    %15 = vector.load %arg6[%c0_12, %c0_13] : memref<64x4xf32, #tpu.memory_space<vmem>>, vector<64x4xf32>
    %cst_14 = arith.constant dense<0.000000e+00> : vector<8x4xf32>
    %16 = tpu.matmul %14, %15, %cst_14 {dimension_numbers = #tpu.dot_dimension_numbers<[1], [0], [0], [1], [0, 0, 1, 1], [], []>} : vector<8x64xf32>, vector<64x4xf32>, vector<8x4xf32> -> vector<8x4xf32>
    %c0_15 = arith.constant 0 : index
    %c0_16 = arith.constant 0 : index
    %17 = vector.load %arg7[%c0_15, %c0_16] : memref<1x4xf32, #tpu.memory_space<vmem>>, vector<1x4xf32>
    %18 = vector.broadcast %17 : vector<1x4xf32> to vector<8x4xf32>
    %19 = arith.addf %16, %18 : vector<8x4xf32>
    %20 = arith.negf %19 : vector<8x4xf32>
    %21 = math.exp %20 : vector<8x4xf32>
    %cst_17 = arith.constant 1.000000e+00 : f32
    %22 = vector.broadcast %cst_17 : f32 to vector<8x4xf32>
    %23 = arith.addf %22, %21 : vector<8x4xf32>
    %24 = arith.divf %22, %23 : vector<8x4xf32>
    %c0_18 = arith.constant 0 : index
    %c0_19 = arith.constant 0 : index
    %25 = vector.load %arg8[%c0_18, %c0_19] : memref<8x4xf32, #tpu.memory_space<vmem>>, vector<8x4xf32>
    tpu.vector_store %arg8[%c0_18, %c0_19], %24 {strides = array<i32>} : memref<8x4xf32, #tpu.memory_space<vmem>>, vector<8x4xf32>,
    return
  }
  func.func @transform_0(%arg0: i32) -> (i32, i32) {
    %c0_i32 = arith.constant 0 : i32
    %c0_i32_0 = arith.constant 0 : i32
    return %arg0, %c0_i32 : i32, i32
  }
  func.func @transform_1(%arg0: i32) -> (i32, i32) {
    %c0_i32 = arith.constant 0 : i32
    %c0_i32_0 = arith.constant 0 : i32
    %c0_i32_1 = arith.constant 0 : i32
    return %c0_i32, %c0_i32_0 : i32, i32
  }
  func.func @transform_2(%arg0: i32) -> (i32, i32) {
    %c0_i32 = arith.constant 0 : i32
    %c0_i32_0 = arith.constant 0 : i32
    %c0_i32_1 = arith.constant 0 : i32
    return %c0_i32, %c0_i32_0 : i32, i32
  }
  func.func @transform_3(%arg0: i32) -> (i32, i32) {
    %c0_i32 = arith.constant 0 : i32
    %c0_i32_0 = arith.constant 0 : i32
    %c0_i32_1 = arith.constant 0 : i32
    return %c0_i32, %c0_i32_0 : i32, i32
  }
  func.func @transform_4(%arg0: i32) -> (i32, i32) {
    %c0_i32 = arith.constant 0 : i32
    %c0_i32_0 = arith.constant 0 : i32
    %c0_i32_1 = arith.constant 0 : i32
    return %c0_i32, %c0_i32_0 : i32, i32
  }
  func.func @transform_5(%arg0: i32) -> (i32, i32) {
    %c0_i32 = arith.constant 0 : i32
    %c0_i32_0 = arith.constant 0 : i32
    %c0_i32_1 = arith.constant 0 : i32
    return %c0_i32, %c0_i32_0 : i32, i32
  }
  func.func @transform_6(%arg0: i32) -> (i32, i32) {
    %c0_i32 = arith.constant 0 : i32
    %c0_i32_0 = arith.constant 0 : i32
    %c0_i32_1 = arith.constant 0 : i32
    return %c0_i32, %c0_i32_0 : i32, i32
  }
  func.func @transform_7(%arg0: i32) -> (i32, i32) {
    %c0_i32 = arith.constant 0 : i32
    %c0_i32_0 = arith.constant 0 : i32
    return %arg0, %c0_i32 : i32, i32
  }
}

</mosaic_0001>

<bundles_post_ra>
// kernel: policy_net_forward.1
= control target key start
LH: loop header
LB: loop body
LE: loop exit
PB: predicated region body
PF: predicated region fallthrough
CT: control target
= control target key end

     0   :  { %12 = vsyncpa [#allocation3], 0  ;;  %s627_s0 = inlined_call_operand.vmem [shape: f32[8,16], index: 0, kind: input, shape index: {}]   ;;  %s628_s1 = inlined_call_operand.hbm [shape: f32[16,64], index: 1, kind: input, shape index: {}]   ;;  %s629_s2 = inlined_call_operand.vmem [shape: f32[1,64], index: 2, kind: input, shape index: {}]   ;;  %s630_s3 = inlined_call_operand.vmem [shape: f32[64,64], index: 3, kind: input, shape index: {}]   ;;  %s631_s4 = inlined_call_operand.hbm [shape: f32[1,64], index: 4, kind: input, shape index: {}]   ;;  %s632_s5 = inlined_call_operand.vmem [shape: f32[64,4], index: 5, kind: input, shape index: {}]   ;;  %s633_s6 = inlined_call_operand.hbm [shape: f32[1,4], index: 6, kind: input, shape index: {}]   ;;  %s634_s7 = inlined_call_operand.vmem [shape: f32[8,4], index: 7, kind: output, shape index: {}]  }
   0x1   :  { %13 = vsyncpa [#allocation5], 0  ;;  %s488_s24 = smov [#allocation4]   ;;  %s489_s26 = smov [#allocation2]  }
   0x2   :  { %s38_s25 = sshll.u32 %s488_s24, 4  ;;  %s21_s27 = sshll.u32 %s489_s26, 4  ;;  %s39_s25 = int_to_ptr.vmem [resolvable:$true] %s38_s25  ;;  %s22_s27 = int_to_ptr.vmem [resolvable:$true] %s21_s27 }
   0x3   :  { %s432_s28 = scalar_lea.vmem %s39_s25, 16  ;;  %s436_s29 = scalar_lea.vmem %s39_s25, 32 }
   0x4   :  { %p433_p0 = scmp.ne.s32.totalorder %s39_s25, %s432_s28  ;;  %p437_p1 = scmp.lt.s32.totalorder %s39_s25, %s39_s25 }
   0x5   :  { %p438_p2 = scmp.lt.s32.totalorder %s436_s29, %s432_s28 }
   0x7   :  { %p439_p3 = por %p438_p2, %p437_p1 }
   0x9   :  { %p440_p4 = pnand %p439_p3, %p433_p0 }
   0xb   :  { %443 = shalt.err (!%p440_p4)
}
   0xc   :  { %41 = dma.hbm_to_vmem [thread:$0]  %s631_s4, 16, %s39_s25, [#allocation5]  }
   0xd   :  { %s452_s9 = scalar_lea.vmem %s22_s27, 256  ;;  %p457_p6 = scmp.lt.s32.totalorder %s22_s27, %s22_s27 }
   0xe   :  { %p453_p5 = scmp.ne.s32.totalorder %s22_s27, %s452_s9  ;;  %p458_p7 = scmp.lt.s32.totalorder %s452_s9, %s452_s9 }
  0x10   :  { %p459_p8 = por %p458_p7, %p457_p6 }
  0x12   :  { %p460_p9 = pnand %p459_p8, %p453_p5 }
  0x14   :  { %463 = shalt.err (!%p460_p9)
}
  0x15   :  { %s490_s10 = smov 128   ;;  %s491_s11 = smov 8  }
  0x16   :  { %27 = dma.hbm_to_vmem [thread:$0]  %s628_s1, 256, %s22_s27, [#allocation3], %s490_s10, %s490_s10, %s491_s11  }
  0x17   :  { %s492_s14 = smov [#allocation6]  }
  0x18   :  { %s50_s15 = sshll.u32 %s492_s14, 4  ;;  %s51_s15 = int_to_ptr.vmem [resolvable:$true] %s50_s15 }
  0x19   :  { %s472_s16 = scalar_lea.vmem %s51_s15, 16  ;;  %s476_s17 = scalar_lea.vmem %s51_s15, 32 }
  0x1a   :  { %p473_p10 = scmp.ne.s32.totalorder %s51_s15, %s472_s16  ;;  %p477_p11 = scmp.lt.s32.totalorder %s51_s15, %s51_s15 }
  0x1b   :  { %p478_p12 = scmp.lt.s32.totalorder %s476_s17, %s472_s16 }
  0x1d   :  { %p479_p13 = por %p478_p12, %p477_p11 }
  0x1f   :  { %p480_p0 = pnand %p479_p13, %p473_p10 }
  0x21   :  { %483 = shalt.err (!%p480_p0)
}
  0x22   :  { %53 = dma.hbm_to_vmem [thread:$0]  %s633_s6, 16, %s51_s15, [#allocation5]  }
  0x23   :  { %484 = dma.done.wait [#allocation3], 256  }
  0x24   :  { %485 = vsyncadd [#allocation3], 4294967040 }
  0x25   :  { %486 = dma.done.wait [#allocation5], 32  }
  0x26   :  { %487 = vsyncadd [#allocation5], 4294967264  ;;  %v493_v0 = vmov 0.0   ;;  %vm494_vm0 = vmmov 0   ;;  %v65_v1 = vld [vmem:[#allocation2 + $0x8] sm:$0xff]  ;;  %v64_v2 = vld [vmem:[#allocation2] sm:$0xff] }
  0x27   :  { %368 = vmatprep.subr.mxu0 %v493_v0  ;;  %372 = vmatprep.mubr.msk.f32.mxu0 %vm494_vm0, %v493_v0  ;;  %v63_v3 = vld [vmem:[%s627_s0] sm:$0xff]  ;;  %vm73_vm1 = vcmask 130048   ;;  %v155_v4 = vld [vmem:[%s630_s3 + $0x38] sm:$0xff]  ;;  %v154_v5 = vld [vmem:[%s630_s3 + $0x30] sm:$0xff]  ;;  %vm163_vm2 = vcmask 523264   ;;  %vm332_vm3 = vcmask 31744  }
  0x28   :  { %375 = vmatprep.subr.mxu1 %v493_v0  ;;  %391 = vmatprep.mubr.msk.f32.mxu1 %vm494_vm0, %v493_v0  ;;  %v153_v6 = vld [vmem:[%s630_s3 + $0x28] sm:$0xff]  ;;  %v152_v7 = vld [vmem:[%s630_s3 + $0x20] sm:$0xff]  ;;  %v151_v8 = vld [vmem:[%s630_s3 + $0x18] sm:$0xff] }
  0x29   :  { %369 = vmatpush3.msra.mxu0 %v65_v1  ;;  %376 = vmatpush3.msra.mxu1 %v155_v4  ;;  %v150_v9 = vld [vmem:[%s630_s3 + $0x10] sm:$0xff]  ;;  %v149_v10 = vld [vmem:[%s630_s3 + $0x8] sm:$0xff]  ;;  %v148_v11 = vld [vmem:[%s630_s3] sm:$0xff] }
  0x2a   :  { %370 = vmatprep.subr.mxu0 %v493_v0  ;;  %377 = vmatprep.subr.mxu1 %v493_v0  ;;  %v245_v12 = vld [vmem:[%s632_s5 + $0x38] sm:$0xff]  ;;  %v244_v13 = vld [vmem:[%s632_s5 + $0x30] sm:$0xff]  ;;  %v243_v14 = vld [vmem:[%s632_s5 + $0x28] sm:$0xff] }
  0x2b   :  { %371 = vmatpush3.msra.mxu0 %v64_v2  ;;  %378 = vmatpush3.msra.mxu1 %v154_v5  ;;  %v242_v15 = vld [vmem:[%s632_s5 + $0x20] sm:$0xff]  ;;  %v241_v16 = vld [vmem:[%s632_s5 + $0x18] sm:$0xff]  ;;  %v240_v22 = vld [vmem:[%s632_s5 + $0x10] sm:$0xff] }
  0x2c   :  { %373 = vmatmul.mubr.msk.f32.vlgmr.msra.gmra.mxu0 %vm73_vm1, %v63_v3  ;;  %379 = vmatprep.subr.mxu1 %v493_v0  ;;  %v340_v17 = vld [vmem:[%s629_s2] ss:$0 sm:$0xff]  ;;  %v239_v23 = vld [vmem:[%s632_s5 + $0x8] sm:$0xff]  ;;  %v342_v25 = vld [vmem:[#allocation4] ss:$0 sm:$0xff] }
  0x2d   :  { %394 = vmatprep.subr.mxu0 %v493_v0  ;;  %380 = vmatpush3.msra.mxu1 %v153_v6  ;;  %v238_v24 = vld [vmem:[%s632_s5] sm:$0xff]  ;;  %v344_v30 = vld [vmem:[#allocation6] ss:$0 sm:$0xff] }
  0x2e   :  { %410 = vmatprep.mubr.msk.f32.mxu0 %vm494_vm0, %v493_v0  ;;  %381 = vmatprep.subr.mxu1 %v493_v0 }
  0x2f   :  { %382 = vmatpush3.msra.mxu1 %v152_v7  ;;  %395 = vmatpush3.msra.mxu0 %v245_v12 }
  0x30   :  { %383 = vmatprep.subr.mxu1 %v493_v0  ;;  %396 = vmatprep.subr.mxu0 %v493_v0 }
  0x31   :  { %384 = vmatpush3.msra.mxu1 %v151_v8  ;;  %397 = vmatpush3.msra.mxu0 %v244_v13 }
  0x32   :  { %385 = vmatprep.subr.mxu1 %v493_v0  ;;  %398 = vmatprep.subr.mxu0 %v493_v0 }
  0x33   :  { %386 = vmatpush3.msra.mxu1 %v150_v9  ;;  %399 = vmatpush3.msra.mxu0 %v243_v14 }
  0x34   :  { %387 = vmatprep.subr.mxu1 %v493_v0  ;;  %400 = vmatprep.subr.mxu0 %v493_v0 }
  0x35   :  { %388 = vmatpush3.msra.mxu1 %v149_v10  ;;  %401 = vmatpush3.msra.mxu0 %v242_v15 }
  0x36   :  { %389 = vmatprep.subr.mxu1 %v493_v0  ;;  %402 = vmatprep.subr.mxu0 %v493_v0 }
  0x37   :  { %390 = vmatpush3.msra.mxu1 %v148_v11  ;;  %403 = vmatpush3.msra.mxu0 %v241_v16 }
  0x38   :  { %404 = vmatprep.subr.mxu0 %v493_v0 }
  0x39   :  { %405 = vmatpush3.msra.mxu0 %v240_v22 }
  0x3a   :  { %406 = vmatprep.subr.mxu0 %v493_v0 }
  0x3b   :  { %407 = vmatpush3.msra.mxu0 %v239_v23 }
  0x3c   :  { %408 = vmatprep.subr.mxu0 %v493_v0 }
  0x3d   :  { %409 = vmatpush3.msra.mxu0 %v238_v24 }
  0xec   :  { %v143_v18 = vpop.f32.mrf.mxu0 }
  0xed   :  { %v144_v19 = vadd.f32 %v340_v17, %v143_v18 }
  0xee   :  { %v374_v20 = vpop.f32.mrf.mxu0 }
  0xef   :  { %v147_v21 = vmax.f32 %v144_v19, 0.0 }
  0xf1   :  { %392 = vmatmul.mubr.msk.f32.vlgmr.msra.gmra.mxu1 %vm163_vm2, %v147_v21 }
 0x1b1   :  { %v233_v26 = vpop.f32.mrf.mxu1 }
 0x1b2   :  { %v234_v27 = vadd.f32 %v342_v25, %v233_v26 }
 0x1b3   :  { %v393_v28 = vpop.f32.mrf.mxu1 }
 0x1b4   :  { %v237_v29 = vmax.f32 %v234_v27, 0.0 }
 0x1b6   :  { %411 = vmatmul.mubr.msk.f32.vlgmr.msra.gmra.mxu0 %vm163_vm2, %v237_v29 }
 0x276   :  { %v322_v31 = vpop.f32.mrf.mxu0 }
 0x277   :  { %v323_v32 = vadd.f32 %v344_v30, %v322_v31 }
 0x278   :  { %v412_v33 = vpop.f32.mrf.mxu0 }
 0x279   :  { %v346_v34 = vmul.f32 -1.442695, %v323_v32 }
 0x27b   :  { %420 = vpow2.f32 %v346_v34 }
 0x288   :  { %v421_v35 = vpop.eup %420 }
 0x289   :  { %v329_v36 = vadd.f32 1.0, %v421_v35 }
 0x28b   :  { %422 = vrcp.f32 %v329_v36 }
 0x298   :  { %v423_v37 = vpop.eup %422 }
 0x299   :  { %333 = vst.msk [vmem:[%s634_s7] sm:$0xff] %vm332_vm3, %v423_v37 }
 0x29a   :  { %338 = vsyncpa [#allocation3], 1 }
 0x29b   :  { %339 = vsyncpa [#allocation5], 1 }

</bundles_post_ra>
